<compile_context>
chip_gen: v6e
topology: v6e:2x2x1
jax: 0.10.0
libtpu: 0.0.40
codegen_flags: <defaults>
</compile_context>

<pallas_src>
import jax
import jax.numpy as jnp
from jax.experimental import pallas as pl
from jax.experimental.pallas import tpu as pltpu


def gcn_kernel(text_ref, adj_ref, w_ref, b_ref, out_ref):
    t = text_ref[...]          # (Bt, Np, F_in)
    a = adj_ref[...]           # (Bt, Np, Np)
    w = w_ref[...]             # (F_in, Fp)
    bias = b_ref[...]          # (1, Fp)

    Bt, Np, F_in = t.shape
    Fp = w.shape[1]

    # hidden = text @ W: fold (Bt, Np) so the MXU sees one (Bt*Np, F_in) tile.
    hidden = jnp.dot(t.reshape(Bt * Np, F_in), w,
                     preferred_element_type=jnp.float32)
    hidden = hidden.reshape(Bt, Np, Fp)

    # torch: adj.sum(dim=1, keepdim=True).squeeze().unsqueeze(-1) == column
    # sums reshaped to (B, N, 1). Cross-sublane reduce (no NxN transpose),
    # exact reciprocal on only Bt*Np values, tiny (Bt,1,Np)->(Bt,Np,1) relayout.
    denom = jnp.sum(a, axis=1, keepdims=True)                  # (Bt, 1, Np)
    inv_denom = pl.reciprocal(denom, approx=False)             # exact 1/x
    inv_denom = jnp.swapaxes(inv_denom, 1, 2)                  # (Bt, Np, 1)

    # agg = adj @ hidden (batched MXU matmul), then row-scale + bias (VPU).
    agg = jnp.einsum("bnm,bmo->bno", a, hidden,
                     preferred_element_type=jnp.float32)
    out_ref[...] = (agg * inv_denom + bias).astype(out_ref.dtype)


def _vmem_capacity_bytes():
    """Physical VMEM per TensorCore; conservative (v7x-sized) fallback."""
    try:
        info = pltpu.get_tpu_info()
        for attr in ("vmem_capacity_bytes", "vmem_bytes", "vmem_size_bytes"):
            v = getattr(info, attr, None)
            if isinstance(v, int) and v > 0:
                return v
    except Exception:
        pass
    return 64 * 1024 * 1024


def _per_graph_and_fixed_bytes(Np, F_in, Fp):
    bpe = 4  # f32
    fixed = 2 * bpe * (F_in * Fp + Fp)                       # resident weight + bias
    per_graph = bpe * (
        2 * (Np * F_in + Np * Np + Np * Fp)                  # 2x double-buffered text/adj/out
        + 2 * Np * Fp                                        # hidden + agg f32 intermediates
        + 2 * Np)                                            # denom / inv_denom
    return per_graph, fixed


def _choose_batch_tile(B, Np, F_in, Fp, budget_bytes):
    per_graph, fixed = _per_graph_and_fixed_bytes(Np, F_in, Fp)
    bt = max(1, (budget_bytes - fixed) // per_graph)
    # Keep enough grid steps for pipelining and v7x megacore sharding.
    min_steps = min(B, 4)
    bt = min(bt, max(1, B // min_steps))
    return int(bt)


def graph_convolution(text, adj, weight, bias, *, batch_tile=None):
    B, N, F_in = text.shape
    F_out = weight.shape[1]

    if bias is None:
        bias = jnp.zeros((F_out,), dtype=weight.dtype)

    # ---- conditional lane-dense output padding (only when overhead <= 12.5%)
    f_pad = (-F_out) % 128
    if f_pad and f_pad * 8 <= F_out:
        Fp = F_out + f_pad
        weight = jnp.pad(weight, ((0, 0), (0, f_pad)))
        bias = jnp.pad(jnp.reshape(bias, (-1,)), (0, f_pad))
    else:
        Fp = F_out
    bias2d = jnp.reshape(bias, (1, Fp))

    # ---- pad N to a multiple of 8 so the folded reshape is a free relayout
    Np = ((N + 7) // 8) * 8

    # ---- VMEM-aware batch tile with a per-generation budget
    cap = _vmem_capacity_bytes()
    budget = min(cap // 2, 64 * 1024 * 1024)     # ~32 MiB on v7x, ~64 MiB on v5e/v6e
    if batch_tile is None:
        Bt = _choose_batch_tile(B, Np, F_in, Fp, budget)
    else:
        Bt = max(1, min(int(batch_tile), B))
    steps = pl.cdiv(B, Bt)
    Bp = steps * Bt

    # ---- zero-pad text / identity-pad adj so padded rows & graphs stay finite
    if (Bp, Np) != (B, N):
        text_p = jnp.zeros((Bp, Np, F_in), text.dtype).at[:B, :N, :].set(text)
        adj_p = jnp.zeros((Bp, Np, Np), adj.dtype).at[:B, :N, :N].set(adj)
        if Np != N:
            idx = jnp.arange(N, Np)
            adj_p = adj_p.at[:, idx, idx].set(1.0)           # padded columns sum to 1
        if Bp != B:
            adj_p = adj_p.at[B:].set(jnp.eye(Np, dtype=adj.dtype))  # padded graphs
        text, adj = text_p, adj_p

    per_graph, fixed = _per_graph_and_fixed_bytes(Np, F_in, Fp)
    footprint = fixed + Bt * per_graph
    vmem_limit = int(min(cap - 4 * 1024 * 1024,
                         max(32 * 1024 * 1024, footprint + 8 * 1024 * 1024)))

    flops = 2 * Bp * Np * (F_in + Np) * Fp
    bytes_accessed = 4 * (Bp * Np * F_in + Bp * Np * Np
                          + F_in * Fp + Fp + Bp * Np * Fp)

    out = pl.pallas_call(
        gcn_kernel,
        out_shape=jax.ShapeDtypeStruct((Bp, Np, Fp), text.dtype),
        grid_spec=pltpu.PrefetchScalarGridSpec(
            num_scalar_prefetch=0,
            grid=(steps,),
            in_specs=[
                pl.BlockSpec((Bt, Np, F_in), lambda b: (b, 0, 0)),
                pl.BlockSpec((Bt, Np, Np), lambda b: (b, 0, 0)),
                pl.BlockSpec((F_in, Fp), lambda b: (0, 0)),
                pl.BlockSpec((1, Fp), lambda b: (0, 0)),
            ],
            out_specs=pl.BlockSpec((Bt, Np, Fp), lambda b: (b, 0, 0)),
        ),
        compiler_params=pltpu.CompilerParams(
            dimension_semantics=("parallel",),
            vmem_limit_bytes=vmem_limit),
        cost_estimate=pl.CostEstimate(flops=flops,
                                      bytes_accessed=bytes_accessed,
                                      transcendentals=0),
    )(text, adj, weight, bias2d)

    if (Bp, Np, Fp) != (B, N, F_out):
        out = out[:B, :N, :F_out]
    return out


def graph_convolution_ref(text, adj, weight, bias):
    hidden = jnp.einsum("bnf,fo->bno", text, weight)
    denom = jnp.sum(adj, axis=1)[..., None]            # (B, N, 1), torch dim=1 sums
    out = jnp.einsum("bnm,bmo->bno", adj, hidden) / denom
    return out + jnp.reshape(bias, (-1,))


def _make_inputs(key, B, N, F_in, F_out):
    k_text, k_adj, k_w, k_b = jax.random.split(key, 4)
    text = jax.random.normal(k_text, (B, N, F_in), dtype=jnp.float32)
    # Positive adjacency so denominators are well away from zero.
    adj = jax.random.uniform(k_adj, (B, N, N), dtype=jnp.float32,
                             minval=0.1, maxval=1.0)
    adj = adj + jnp.eye(N, dtype=jnp.float32)[None, :, :]
    weight = jax.random.normal(k_w, (F_in, F_out), dtype=jnp.float32) * 0.1
    bias = jax.random.normal(k_b, (F_out,), dtype=jnp.float32) * 0.1
    return text, adj, weight, bias


if __name__ == "__main__":
    key = jax.random.PRNGKey(0)
    keys = jax.random.split(key, 3)

    # (B, N, F_in, F_out, forced batch tile)
    cases = [
        (2, 8, 16, 32, None),   # clean path, no padding
        (3, 12, 16, 24, None),  # N padded 12 -> 16
        (3, 8, 16, 32, 2),      # batch tail: B=3 padded to 4 with Bt=2
    ]

    for k, (B, N, F_in, F_out, bt) in zip(keys, cases):
        text, adj, weight, bias = _make_inputs(k, B, N, F_in, F_out)
        out = graph_convolution(text, adj, weight, bias, batch_tile=bt)
        out = jax.block_until_ready(out)
        ref = graph_convolution_ref(text, adj, weight, bias)
        assert out.shape == (B, N, F_out)
        assert jnp.allclose(out, ref, atol=1e-5, rtol=1e-5), \
            f"mismatch vs reference for case {(B, N, F_in, F_out, bt)}"

    print("KERNEL_OK")
</pallas_src>

<mosaic_0001>
module attributes {stable_mosaic.version = 11 : i64} {
  func.func @gcn_kernel(%arg0: i32, %arg1: memref<1x8x16xf32, #tpu.memory_space<vmem>>, %arg2: memref<1x8x8xf32, #tpu.memory_space<vmem>>, %arg3: memref<16x32xf32, #tpu.memory_space<vmem>>, %arg4: memref<1x32xf32, #tpu.memory_space<vmem>>, %arg5: memref<1x8x32xf32, #tpu.memory_space<vmem>>) attributes {dimension_semantics = [#tpu.dimension_semantics<parallel>], iteration_bounds = array<i64: 2>, scalar_prefetch = 0 : i64, scratch_operands = 0 : i64, tpu.core_type = #tpu.core_type<tc>, window_params = [{transform_indices = @transform_0, window_bounds = array<i64: 1, 8, 16>}, {transform_indices = @transform_1, window_bounds = array<i64: 1, 8, 8>}, {pipeline_mode = #tpu.pipeline_mode<synchronous>, transform_indices = @transform_2, window_bounds = array<i64: 16, 32>}, {pipeline_mode = #tpu.pipeline_mode<synchronous>, transform_indices = @transform_3, window_bounds = array<i64: 1, 32>}, {transform_indices = @transform_4, window_bounds = array<i64: 1, 8, 32>}]} {
    %c0 = arith.constant 0 : index
    %c0_0 = arith.constant 0 : index
    %c0_1 = arith.constant 0 : index
    %0 = vector.load %arg1[%c0, %c0_0, %c0_1] : memref<1x8x16xf32, #tpu.memory_space<vmem>>, vector<1x8x16xf32>
    %c0_2 = arith.constant 0 : index
    %c0_3 = arith.constant 0 : index
    %c0_4 = arith.constant 0 : index
    %1 = vector.load %arg2[%c0_2, %c0_3, %c0_4] : memref<1x8x8xf32, #tpu.memory_space<vmem>>, vector<1x8x8xf32>
    %c0_5 = arith.constant 0 : index
    %c0_6 = arith.constant 0 : index
    %2 = vector.load %arg3[%c0_5, %c0_6] : memref<16x32xf32, #tpu.memory_space<vmem>>, vector<16x32xf32>
    %c0_7 = arith.constant 0 : index
    %c0_8 = arith.constant 0 : index
    %3 = vector.load %arg4[%c0_7, %c0_8] : memref<1x32xf32, #tpu.memory_space<vmem>>, vector<1x32xf32>
    %4 = vector.shape_cast %0 : vector<1x8x16xf32> to vector<8x16xf32>
    %cst = arith.constant dense<0.000000e+00> : vector<8x32xf32>
    %5 = tpu.matmul %4, %2, %cst {dimension_numbers = #tpu.dot_dimension_numbers<[1], [0], [0], [1], [0, 0, 1, 1], [], []>} : vector<8x16xf32>, vector<16x32xf32>, vector<8x32xf32> -> vector<8x32xf32>
    %6 = vector.shape_cast %5 : vector<8x32xf32> to vector<1x8x32xf32>
    %cst_9 = arith.constant dense<0.000000e+00> : vector<1x8xf32>
    %7 = vector.multi_reduction <add>, %1, %cst_9 [1] : vector<1x8x8xf32> to vector<1x8xf32>
    %8 = vector.shape_cast %7 : vector<1x8xf32> to vector<1x1x8xf32>
    %9 = tpu.reciprocal %8 : vector<1x1x8xf32> -> vector<1x1x8xf32>
    %10 = tpu.transpose %9, [0, 2, 1] : vector<1x1x8xf32> -> vector<1x8x1xf32>
    "tpu.trace_start"() <{level = 10 : i32, message = "bnm,bmo->bno"}> : () -> ()
    %cst_10 = arith.constant dense<0.000000e+00> : vector<1x8x32xf32>
    %11 = tpu.matmul %1, %6, %cst_10 {dimension_numbers = #tpu.dot_dimension_numbers<[2], [1], [1], [2], [0, 0, 0, 1, 1, 2], [0], [0]>} : vector<1x8x8xf32>, vector<1x8x32xf32>, vector<1x8x32xf32> -> vector<1x8x32xf32>
    "tpu.trace_stop"() : () -> ()
    %12 = vector.broadcast %10 : vector<1x8x1xf32> to vector<1x8x32xf32>
    %13 = arith.mulf %11, %12 : vector<1x8x32xf32>
    %14 = vector.shape_cast %3 : vector<1x32xf32> to vector<1x1x32xf32>
    %15 = vector.broadcast %14 : vector<1x1x32xf32> to vector<1x8x32xf32>
    %16 = arith.addf %13, %15 : vector<1x8x32xf32>
    %c0_11 = arith.constant 0 : index
    %c0_12 = arith.constant 0 : index
    %c0_13 = arith.constant 0 : index
    %17 = vector.load %arg5[%c0_11, %c0_12, %c0_13] : memref<1x8x32xf32, #tpu.memory_space<vmem>>, vector<1x8x32xf32>
    tpu.vector_store %arg5[%c0_11, %c0_12, %c0_13], %16 {strides = array<i32>} : memref<1x8x32xf32, #tpu.memory_space<vmem>>, vector<1x8x32xf32>,
    return
  }
  func.func @transform_0(%arg0: i32) -> (i32, i32, i32) {
    %c0_i32 = arith.constant 0 : i32
    %c0_i32_0 = arith.constant 0 : i32
    %c0_i32_1 = arith.constant 0 : i32
    return %arg0, %c0_i32, %c0_i32_0 : i32, i32, i32
  }
  func.func @transform_1(%arg0: i32) -> (i32, i32, i32) {
    %c0_i32 = arith.constant 0 : i32
    %c0_i32_0 = arith.constant 0 : i32
    %c0_i32_1 = arith.constant 0 : i32
    return %arg0, %c0_i32, %c0_i32_0 : i32, i32, i32
  }
  func.func @transform_2(%arg0: i32) -> (i32, i32) {
    %c0_i32 = arith.constant 0 : i32
    %c0_i32_0 = arith.constant 0 : i32
    %c0_i32_1 = arith.constant 0 : i32
    return %c0_i32, %c0_i32_0 : i32, i32
  }
  func.func @transform_3(%arg0: i32) -> (i32, i32) {
    %c0_i32 = arith.constant 0 : i32
    %c0_i32_0 = arith.constant 0 : i32
    %c0_i32_1 = arith.constant 0 : i32
    return %c0_i32, %c0_i32_0 : i32, i32
  }
  func.func @transform_4(%arg0: i32) -> (i32, i32, i32) {
    %c0_i32 = arith.constant 0 : i32
    %c0_i32_0 = arith.constant 0 : i32
    %c0_i32_1 = arith.constant 0 : i32
    return %arg0, %c0_i32, %c0_i32_0 : i32, i32, i32
  }
}

</mosaic_0001>

<bundles_post_ra>
// kernel: tpu_custom_call.1
= control target key start
LH: loop header
LB: loop body
LE: loop exit
PB: predicated region body
PF: predicated region fallthrough
CT: control target
= control target key end

     0   :  { %s1088_s0 = inlined_call_operand.hbm [shape: f32[2,8,16], index: 0, kind: input, shape index: {}]   ;;  %s1089_s1 = inlined_call_operand.hbm [shape: f32[2,8,8], index: 1, kind: input, shape index: {}]   ;;  %s1090_s2 = inlined_call_operand.hbm [shape: f32[16,32], index: 2, kind: input, shape index: {}]   ;;  %s1091_s3 = inlined_call_operand.vmem [shape: f32[1,32], index: 3, kind: input, shape index: {}]   ;;  %s1092_s4 = inlined_call_operand.hbm [shape: f32[2,8,32], index: 4, kind: output, shape index: {}]  }
   0x1   :  { %1097 = sst [smem:[#allocation13_spill]] %s1090_s2 }
   0x2   :  { %9 = vsyncpa [#allocation3], 0 }
   0x3   :  { %11 = vsyncpa [#allocation3 + $0x1], 0 }
   0x4   :  { %12 = vsyncpa [#allocation6], 0 }
   0x5   :  { %14 = vsyncpa [#allocation6 + $0x1], 0 }
   0x6   :  { %15 = vsyncpa [#allocation4], 0 }
   0x7   :  { %17 = vsyncpa [#allocation4 + $0x1], 0  ;;  %s885_s15 = smov 0   ;;  %s887_s16 = smov 0  }
   0x8   :  { %s889_s17 = smov 0   ;;  %s891_s18 = smov 0  }
   0x9 LB: > { %s906_s19 = sadd.s32 4294967295, %s849_s18   ;;  %s588_s20 = sadd.s32 4294967294, %s849_s18   ;;  %s849_s18 = sphi %s891_s18, %s1116_s18   ;;  %s845_s17 = sphi %s889_s17, %s1115_s17   ;;  %s841_s16 = sphi %s887_s16, %s1114_s16   ;;  %s837_s15 = sphi %s885_s15, %s1113_s15  }
   0xa   : > { %p43_p0 = scmp.ne.s32.totalorder %s841_s16, %s837_s15  ;;  %p1093_p1 = scmp.eq.s32.totalorder %s906_s19, 0 }
   0xb   : > { %p141_p3 = scmp.eq.s32.totalorder %s588_s20, 1  ;;  %p589_p5 = scmp.ge.s32.totalorder %s849_s18, 1 }
   0xc   : > { %p915_p4 = por %p1093_p1, %p43_p0  ;;  %p148_p7 = scmp.lt.s32.totalorder %s849_s18, 3 }
   0xd   : > { %p920_p6 = por %p141_p3, %p43_p0  ;;  %s851_s24 = smov [#allocation7]  }
   0xe   : > { %s1098_s21 = scalar_select %p915_p4, 1, 0 }
   0xf   : > { %s1099_s22 = scalar_select %p920_p6, 1, 0 }
  0x10   : > { %p925_p8 = pnand %p589_p5, %p148_p7  ;;  %s160_s25 = sshll.u32 %s851_s24, 4  ;;  %s161_s25 = int_to_ptr.vmem [resolvable:$true] %s160_s25 }
  0x11   : > { %s939_s27 = sadd.s32 1, %s849_s18   ;;  %s30_s28 = sadd.s32 1, %s845_s17 }
  0x12   : > { %s1100_s23 = scalar_select %p925_p8, 1, 0 }
  0x13   : > { %p635_p9 = pneg %p925_p8  ;;  %s27_s29 = ssub.s32 %s849_s18, %s939_s27 }
  0x14   : > { %s706_s30 = scalar_lea.vmem %s161_s25, 256  ;;  %p714_p5 = scmp.lt.s32.totalorder %s161_s25, %s161_s25 }
  0x15   : > { %p934_p11 = pnand %p635_p9, %p1093_p1  ;;  %p707_p13 = scmp.ne.s32.totalorder %s161_s25, %s706_s30 }
  0x16   : > { %p715_p7 = scmp.lt.s32.totalorder %s706_s30, %s706_s30 }
  0x17   : > { %p697_p12 = pneg %p934_p11 }
  0x18   : > { %p716_p10 = por %p715_p7, %p714_p5 }
  0x19   : > { %p709_p0 = pnand %p707_p13, %p697_p12 }
  0x1b   : > { %p710_p3 = pneg %p709_p0 }
  0x1d   : > { %p717_p2 = pnand %p716_p10, %p710_p3 }
  0x1f   : > { %720 = shalt.err (!%p717_p2)
}
  0x20   : > { %s852_s5 = smov 128   ;;  %s853_s6 = smov 8  }
  0x21   : > { %s1102_s2 = sld [smem:[#allocation13_spill]]  ;;  %p28_p9 = scmp.eq.s32.totalorder %s27_s29, 0 }
  0x22   : > { %p37_p12 = scmp.ne.s32.totalorder %s845_s17, %s841_s16  ;;  %p38_p10 = scmp.eq.s32.totalorder %s849_s18, 0 }
  0x23   : > { %p651_p2 = scmp.lt.s32.totalorder %s849_s18, 2  ;;  %p1103_p0 = scmp.eq.s32.totalorder %s906_s19, 1 }
  0x24   : > { %s956_s9 = scalar_select %p28_p9, %s845_s17, %s30_s28  }
  0x25   : > { %p39_p13 = por %p38_p10, %p37_p12  ;;  %p960_p3 = por %p1103_p0, %p37_p12 }
  0x26   : > { %s177_s11 = sand.u32 1, %s845_s17   ;;  %s593_s12 = sshll.u32 %s849_s18, 7 }
  0x27   : > { %638 = dma.hbm_to_vmem [thread:$0]  (!%p934_p11), %s1102_s2, 256, %s161_s25, [#allocation6], %s852_s5, %s852_s5, %s853_s6  }
  0x28   : > { %s1104_s10 = scalar_select %p960_p3, 1, 0 }
  0x29   : > { %s966_s13 = sshll.u32 %s177_s11, 3  ;;  %s971_s24 = scalar_lea.hbm %s1088_s0, %s593_s12 }
  0x2a   : > { %s181_s25 = scalar_lea.vmem [#allocation2], %s966_s13  ;;  %p974_p11 = pnand %p651_p2, %p39_p13 }
  0x2b   : > { %s188_s26 = sshll.u32 %s181_s25, 4  ;;  %s981_s5 = scalar_lea.hbm %s1089_s1, %s593_s12  ;;  %s189_s26 = int_to_ptr.vmem [resolvable:$true] %s188_s26 }
  0x2c   : > { %s178_s6 = scalar_lea.sflag [#allocation3], %s177_s11  ;;  %s721_s7 = scalar_lea.hbm %s971_s24, 128 }
  0x2d   : > { %p722_p5 = scmp.ne.s32.totalorder %s971_s24, %s721_s7  ;;  %p723_p7 = pneg %p974_p11 }
  0x2e   : > { %s726_s20 = scalar_lea.hbm %s1088_s0, 256  ;;  %p727_p10 = scmp.lt.s32.totalorder %s971_s24, %s1088_s0 }
  0x2f   : > { %p724_p9 = pnand %p723_p7, %p722_p5  ;;  %p728_p2 = scmp.lt.s32.totalorder %s726_s20, %s721_s7 }
  0x31   : > { %p725_p12 = pneg %p724_p9  ;;  %p729_p13 = por %p728_p2, %p727_p10 }
  0x33   : > { %p730_p0 = pnand %p729_p13, %p725_p12 }
  0x35   : > { %733 = shalt.err (!%p730_p0)
}
  0x36   : > { %s734_s11 = scalar_lea.vmem %s189_s26, 128  ;;  %s854_s12 = smov [#allocation2]  }
  0x37   : > { %p735_p1 = scmp.ne.s32.totalorder %s189_s26, %s734_s11  ;;  %s739_s29 = sshll.u32 %s854_s12, 4  ;;  %s740_s29 = int_to_ptr.vmem [resolvable:$false] %s739_s29 }
  0x38   : > { %s741_s30 = scalar_lea.vmem %s740_s29, 256  ;;  %p742_p9 = scmp.lt.s32.totalorder %s189_s26, %s740_s29 }
  0x39   : > { %p737_p6 = pnand %p735_p1, %p723_p7  ;;  %p743_p3 = scmp.lt.s32.totalorder %s741_s30, %s734_s11 }
  0x3b   : > { %p738_p5 = pneg %p737_p6  ;;  %p744_p4 = por %p743_p3, %p742_p9 }
  0x3d   : > { %p745_p8 = pnand %p744_p4, %p738_p5 }
  0x3f   : > { %748 = shalt.err (!%p745_p8)
}
  0x40   : > { %642 = dma.hbm_to_vmem [thread:$0]  (!%p974_p11), %s971_s24, 128, %s189_s26, %s178_s6  }
  0x41   : > { %s195_s2 = sand.u32 1, %s849_s18   ;;  %s199_s7 = scalar_lea.vmem [#allocation5], %s966_s13 }
  0x42   : > { %s206_s8 = sshll.u32 %s199_s7, 4  ;;  %s196_s14 = scalar_lea.sflag [#allocation6], %s195_s2  ;;  %s207_s8 = int_to_ptr.vmem [resolvable:$true] %s206_s8 }
  0x43   : > { %s749_s20 = scalar_lea.hbm %s981_s5, 128  ;;  %s754_s12 = scalar_lea.hbm %s1089_s1, 256 }
  0x44   : > { %p750_p1 = scmp.ne.s32.totalorder %s981_s5, %s749_s20  ;;  %p755_p8 = scmp.lt.s32.totalorder %s981_s5, %s1089_s1 }
  0x45   : > { %p756_p3 = scmp.lt.s32.totalorder %s754_s12, %s749_s20 }
  0x46   : > { %p752_p4 = pnand %p750_p1, %p723_p7 }
  0x47   : > { %p757_p12 = por %p756_p3, %p755_p8 }
  0x48   : > { %p753_p6 = pneg %p752_p4 }
  0x4a   : > { %p758_p10 = pnand %p757_p12, %p753_p6 }
  0x4c   : > { %761 = shalt.err (!%p758_p10)
}
  0x4d   : > { %s762_s13 = scalar_lea.vmem %s207_s8, 128  ;;  %s855_s24 = smov [#allocation5]  }
  0x4e   : > { %p763_p2 = scmp.ne.s32.totalorder %s207_s8, %s762_s13  ;;  %s767_s26 = sshll.u32 %s855_s24, 4  ;;  %s768_s26 = int_to_ptr.vmem [resolvable:$false] %s767_s26 }
  0x4f   : > { %s769_s6 = scalar_lea.vmem %s768_s26, 256  ;;  %p770_p5 = scmp.lt.s32.totalorder %s207_s8, %s768_s26 }
  0x50   : > { %p765_p13 = pnand %p763_p2, %p723_p7  ;;  %p771_p9 = scmp.lt.s32.totalorder %s769_s6, %s762_s13 }
  0x52   : > { %p766_p0 = pneg %p765_p13  ;;  %p772_p1 = por %p771_p9, %p770_p5 }
  0x54   : > { %p773_p4 = pnand %p772_p1, %p766_p0 }
  0x56   : > { %776 = shalt.err (!%p773_p4)
}
  0x57   : > { %645 = dma.hbm_to_vmem [thread:$0]  (!%p974_p11), %s981_s5, 128, %s207_s8, %s196_s14  }
  0x58   : > { %p1106_p6 = scmp.ne.s32.totalorder %s1100_s23, 0 }
  0x59   : > { %s1026_s2 = sand.u32 (!%p1106_p6), 1, %s841_s16   ;;  %p1107_p7 = scmp.ne.s32.totalorder (!%p1106_p6), %s1098_s21, 0 }
  0x5a   : > { %215 = sbr.rel (%p1106_p6) target bundleno = 512 (0x200), region = 36  ;;  %s1029_s7 = sshll.u32 (!%p1106_p6), %s1026_s2, 3 }
  0x5b   : > { %s218_s20 = scalar_lea.sflag (!%p1106_p6), [#allocation3], %s1026_s2  ;;  %s221_s25 = scalar_lea.vmem (!%p1106_p6), [#allocation2], %s1029_s7 }
  0x5f   : > { %820 = dma.done.wait (%p1107_p7), %s218_s20, 128  }
  0x60   : > { %822 = vsyncadd (%p1107_p7), %s218_s20, 4294967168  ;;  %s226_s23 = sand.u32 1, %s906_s19   ;;  %s230_s5 = scalar_lea.vmem [#allocation5], %s1029_s7 }
  0x61   : > { %s227_s28 = scalar_lea.sflag [#allocation6], %s226_s23 }
  0x62   : > { %824 = dma.done.wait (%p1107_p7), %s227_s28, 128  }
  0x63   : > { %826 = vsyncadd (%p1107_p7), %s227_s28, 4294967168  ;;  %p1108_p11 = scmp.eq.s32.totalorder %s906_s19, 0 }
  0x65   : > { %828 = dma.done.wait (%p1108_p11), [#allocation6], 256   ;;  %p1109_p8 = pmov %p1108_p11 }
  0x66   : > { %v856_v0 = vmov 0.0   ;;  %vm857_vm0 = vmmov 0   ;;  %vm343_vm1 = vcmask 64512   ;;  %v267_v1 = vld [vmem:[#allocation7 + $0x8] sm:$0xff]  ;;  %v266_v2 = vld [vmem:[#allocation7] sm:$0xff]  ;;  %vm269_vm2 = vcmask 130048  }
  0x67   : > { %830 = vsyncadd (%p1109_p8), [#allocation6], 4294967040  ;;  %613 = vmatprep.subr.mxu0 %v856_v0  ;;  %617 = vmatprep.mubr.msk.f32.mxu0 %vm857_vm0, %v856_v0  ;;  %v264_v3 = vld [vmem:[%s221_s25] sm:$0xff]  ;;  %v265_v4 = vld [vmem:[%s230_s5] sm:$0xff]  ;;  %v858_v13 = vmov 0   ;;  %s605_s14 = sshll.u32 %s906_s19, 7 }
  0x68   : > { %620 = vmatprep.subr.mxu1 %v856_v0  ;;  %622 = vmatprep.mubr.msk.f32.mxu1 %vm857_vm0, %v856_v0  ;;  %v344_v5 = vsel %vm343_vm1, %v265_v4, 0.0  ;;  %v603_v18 = vld [vmem:[%s1091_s3] ss:$0 sm:$0xff]  ;;  %s263_s11 = scalar_lea.vmem [#allocation8], %s1029_s7  ;;  %vm470_vm3 = vcmask 261120   ;;  %s484_s13 = scalar_lea.hbm %s1092_s4, %s605_s14 }
  0x69   : > { %614 = vmatpush3.msra.mxu0 %v267_v1  ;;  %v345_v6 = vrot.slane %v344_v5, 4  ;;  %s486_s12 = sshll.u32 %s263_s11, 4  ;;  %s473_s24 = scalar_lea.sflag [#allocation4], %s1026_s2  ;;  %s487_s12 = int_to_ptr.vmem [resolvable:$true] %s486_s12 }
  0x6a   : > { %615 = vmatprep.subr.mxu0 %v856_v0  ;;  %s777_s26 = scalar_lea.vmem %s487_s12, 128  ;;  %p1110_p12 = scmp.ne.s32.totalorder %s1104_s10, 0 }
  0x6b   : > { %616 = vmatpush3.msra.mxu0 %v266_v2  ;;  %v346_v7 = vadd.f32 %v345_v6, %v344_v5  ;;  %p778_p3 = scmp.ne.s32.totalorder %s487_s12, %s777_s26  ;;  %s859_s6 = smov [#allocation8]  }
  0x6c   : > { %618 = vmatmul.mubr.msk.f32.vlgmr.msra.gmra.mxu0 %vm269_vm2, %v264_v3  ;;  %s781_s19 = sshll.u32 %s859_s6, 4  ;;  %s782_s19 = int_to_ptr.vmem [resolvable:$false] %s781_s19 }
  0x6d   : > { %v347_v8 = vrot.slane %v346_v7, 2  ;;  %p779_p10 = pnand %p778_p3, %p1110_p12  ;;  %s783_s7 = scalar_lea.vmem %s782_s19, 256 }
  0x6e   : > { %p784_p13 = scmp.lt.s32.totalorder %s487_s12, %s782_s19  ;;  %p785_p0 = scmp.lt.s32.totalorder %s783_s7, %s777_s26 }
  0x6f   : > { %v348_v9 = vadd.f32 %v347_v8, %v346_v7  ;;  %p780_p2 = pneg %p779_p10 }
  0x70   : > { %p786_p5 = por %p785_p0, %p784_p13 }
  0x71   : > { %v349_v10 = vrot.slane %v348_v9, 1 }
  0x72   : > { %p787_p9 = pnand %p786_p5, %p780_p2 }
  0x73   : > { %v350_v11 = vadd.f32 %v349_v10, %v348_v9 }
  0x75   : > { %693 = vrcp.f32 %v350_v11 }
  0x82   : > { %v694_v12 = vpop.eup %693 }
  0x83   : > { %352 = vxpose.xlu0.b32.start.end [1/1] (short) (narrow) %v694_v12, 8 }
  0xac   : > { %692 = vset.pattern.permute.xlu0 %v858_v13 }
  0xff   : > { %v368_v14 = vpop.trf.xlu0 }
 0x100   : > { %459 = vperm.xlu0 %692, %v368_v14  }
 0x12c   : > { %v339_v15 = vpop.f32.mrf.mxu0 }
 0x12d   : > { %621 = vmatpush3.msra.mxu1 %v339_v15 }
 0x12e   : > { %v619_v16 = vpop.f32.mrf.mxu0  ;;  %623 = vmatmul.mubr.msk.f32.vlgmr.msra.gmra.mxu1 %vm343_vm1, %v265_v4 }
 0x17b   : > { %v460_v17 = vpop.permute.xlu0 %459 }
 0x1ee   : > { %v453_v19 = vpop.f32.mrf.mxu1 }
 0x1ef   : > { %v462_v20 = vmul.f32 %v460_v17, %v453_v19 }
 0x1f0   : > { %v624_v21 = vpop.f32.mrf.mxu1 }
 0x1f1   : > { %v469_v22 = vadd.f32 %v603_v18, %v462_v20 }
 0x1f3   : > { %471 = vst.msk [vmem:[%s263_s11] sm:$0xff] %vm470_vm3, %v469_v22 }
 0x1f4   : > { %790 = shalt.err (!%p787_p9)
}
 0x1f5   : > { %s791_s20 = scalar_lea.hbm %s484_s13, 128  ;;  %s795_s23 = scalar_lea.hbm %s1092_s4, 256 }
 0x1f6   : > { %p792_p1 = scmp.ne.s32.totalorder %s484_s13, %s791_s20  ;;  %p796_p7 = scmp.lt.s32.totalorder %s484_s13, %s1092_s4 }
 0x1f7   : > { %p797_p11 = scmp.lt.s32.totalorder %s795_s23, %s791_s20 }
 0x1f8   : > { %p793_p4 = pnand %p792_p1, %p1110_p12 }
 0x1f9   : > { %p798_p8 = por %p797_p11, %p796_p7 }
 0x1fa   : > { %p794_p6 = pneg %p793_p4 }
 0x1fc   : > { %p799_p3 = pnand %p798_p8, %p794_p6 }
 0x1fe   : > { %802 = shalt.err (!%p799_p3)
}
 0x1ff   : > { %633 = dma.vmem_to_hbm [thread:$0]  (%p1110_p12), %s487_s12, 128, %s484_s13, %s473_s24  }
 0x200 PF: > { %s498_s21 = sand.u32 1, %s837_s15   ;;  %p1111_p10 = scmp.ne.s32.totalorder %s1099_s22, 0 }
 0x201   : > { %p1112_p2 = scmp.ge.s32.totalorder %s849_s18, 2  ;;  %s499_s8 = scalar_lea.sflag [#allocation4], %s498_s21 }
 0x203   : > { %p647_p13 = pnand %p1112_p2, %p1111_p10 }
 0x205   : > { %p648_p0 = pneg %p647_p13 }
 0x207   : > { %832 = dma.done.wait (%p648_p0), %s499_s8, 128  }
 0x208   : > { %834 = vsyncadd (%p648_p0), %s499_s8, 4294967168  ;;  %p20_p5 = scmp.ge.s32.totalorder %s939_s27, 4   ;;  %s1113_s15 = smov %s841_s16 }
 0x209   : > { %s1114_s16 = smov %s845_s17  ;;  %s1115_s17 = smov %s956_s9 }
 0x20a   : > { %s1116_s18 = smov %s939_s27  ;;  %22 = sbr.rel (!%p20_p5) target bundleno = 9 (0x9), region = 98 }
 0x20f   :  { %504 = vsyncpa [#allocation3], 1 }
 0x210   :  { %506 = vsyncpa [#allocation3 + $0x1], 1 }
 0x211   :  { %507 = vsyncpa [#allocation6], 1 }
 0x212   :  { %509 = vsyncpa [#allocation6 + $0x1], 1 }
 0x213   :  { %510 = vsyncpa [#allocation4], 1 }
 0x214   :  { %512 = vsyncpa [#allocation4 + $0x1], 1 }

</bundles_post_ra>
